<compile_context>
chip_gen: v7x
topology: tpu7x:2x2x1
jax: 0.10.0
libtpu: 0.0.40
codegen_flags: <defaults>
</compile_context>

<pallas_src>
import functools

import jax
import jax.numpy as jnp
import numpy as np
from jax.experimental import pallas as pl
from jax.experimental.pallas import tpu as pltpu


# ----------------------------- kernels ------------------------------------ #

def _embed_kernel(patches_ref, wp_ref, pos_ref, out_ref, *, seq_len):
    """No-mask path: projection + folded (bias, CLS, pos) add."""
    bt, sp, p = patches_ref.shape
    h = wp_ref.shape[-1]
    # sp % 8 == 0 (host-padded) -> this collapse is layout-preserving (no copy).
    x = patches_ref[...].reshape(bt * sp, p)
    proj = jnp.dot(x, wp_ref[...], preferred_element_type=jnp.float32)
    # pos_ref row 0 = cls + pos[0] (proj row 0 is the zero CLS slot),
    # rows 1..N = pos[1..N] + conv bias, tail rows are padding (sliced off).
    res = proj.reshape(bt, sp, h) + pos_ref[...]
    out_ref[...] = res[:, :seq_len, :].astype(out_ref.dtype)
    # TODO(synk): nn.Dropout(hidden_dropout_prob) is the identity in eval mode.


def _embed_mask_kernel(patches_ref, mask_ref, wp_ref, mask_tok_ref, pos_ref,
                       out_ref, *, seq_len):
    """bool_masked_pos path: projection + mask-token mixing + folded adds."""
    bt, sp, p = patches_ref.shape
    h = wp_ref.shape[-1]
    x = patches_ref[...].reshape(bt * sp, p)
    proj = jnp.dot(x, wp_ref[...], preferred_element_type=jnp.float32)
    proj = proj.reshape(bt, sp, h)
    w = mask_ref[...]                                  # (bt, sp, 1); row 0 forced to 0
    # mask_tok_ref is pre-compensated by -bias host-side, since bias lives in pos_ref:
    #   masked row:   0 + (mask_tok - b) + (pos + b) == mask_tok + pos
    #   unmasked row: proj + 0 + (pos + b)           == proj + b + pos
    proj = proj * (1.0 - w) + mask_tok_ref[...] * w
    res = proj + pos_ref[...]
    out_ref[...] = res[:, :seq_len, :].astype(out_ref.dtype)


# ----------------------------- wrapper ------------------------------------ #

def _vmem_capacity_bytes():
    try:
        info = pltpu.get_tpu_info()
        cap = getattr(info, "vmem_capacity_bytes", None)
        if cap:
            return int(cap)
    except Exception:
        pass
    return 64 << 20   # conservative: v7x per-TensorCore VMEM


def data2vec_vision_embeddings(pixel_values, params, bool_masked_pos=None, *,
                               patch_size, compute_dtype=jnp.bfloat16,
                               out_dtype=None, batch_tile=None):
    """pixel_values: (B, C, H_img, W_img) f32.

    params:
      proj_w  (hidden, C, ph, pw)   Conv2d weight of the patch projection
      proj_b  (hidden,)
      cls_token            (1, 1, hidden)
      mask_token           (1, 1, hidden)
      position_embeddings  (1, num_patches + 1, hidden)
    """
    B, C, Himg, Wimg = pixel_values.shape
    ph = pw = patch_size
    Hp, Wp = Himg // ph, Wimg // pw
    N = Hp * Wp
    P = C * ph * pw
    H = params["proj_w"].shape[0]
    S = N + 1
    S_pad = pl.cdiv(S, 8) * 8
    out_dtype = pixel_values.dtype if out_dtype is None else out_dtype

    # TODO(synk): interpolate_pos_encoding's bicubic resize (image size !=
    # trained size) is host-side glue and not implemented; fail loudly instead.
    assert params["position_embeddings"].shape[1] == S, (
        "image/patch size does not match position_embeddings; "
        "interpolate_pos_encoding is not supported by this kernel")

    # ---- host-side layout plumbing (pure reshapes/pads, no hidden compute) ----
    # im2col in (channel, kh, kw) order matching the Conv2d weight flattening;
    # prepend one zero row (the CLS slot -> proj row 0 == 0) and pad the
    # sequence dim up to a multiple of 8.  Cast once to the MXU compute dtype.
    x = pixel_values.reshape(B, C, Hp, ph, Wp, pw)
    x = x.transpose(0, 2, 4, 1, 3, 5).reshape(B, N, P)
    x = jnp.pad(x, ((0, 0), (1, S_pad - S), (0, 0))).astype(compute_dtype)

    wp = params["proj_w"].reshape(H, P).T.astype(compute_dtype)          # (P, H)
    bp = params["proj_b"].reshape(1, H).astype(jnp.float32)
    cls = params["cls_token"].reshape(1, H).astype(jnp.float32)
    pos = params["position_embeddings"].reshape(S, H).astype(jnp.float32)
    # Fold conv bias + CLS token into one additive table (S_pad, H):
    #   row 0             : cls + pos[0]
    #   rows 1..N         : pos[1..N] + bias
    #   rows N+1..S_pad-1 : zeros (padding, sliced off before the store)
    pos_tab = jnp.concatenate(
        [cls + pos[:1], pos[1:] + bp,
         jnp.zeros((S_pad - S, H), jnp.float32)], axis=0)

    masked = bool_masked_pos is not None
    if masked:
        w = bool_masked_pos.astype(jnp.float32).reshape(B, N)
        w = jnp.pad(w, ((0, 0), (1, S_pad - S)))[..., None]              # (B, S_pad, 1)
        mask_tok = params["mask_token"].reshape(1, H).astype(jnp.float32) - bp

    # ---- batch tile: target ~512 matmul rows/step, bounded by VMEM budget ----
    def _nbytes(shape, dtype):
        return int(np.prod(shape)) * jnp.dtype(dtype).itemsize

    def _block_bytes(bt):
        b = 2 * _nbytes((bt, S_pad, P), compute_dtype)      # patches (double-buffered)
        b += 2 * _nbytes((P, H), compute_dtype)             # weight
        b += 2 * _nbytes((S_pad, H), jnp.float32)           # pos table
        b += 2 * _nbytes((bt, S, H), out_dtype)             # output
        b += 2 * _nbytes((bt, S_pad, H), jnp.float32)       # f32 proj / result temporaries
        if masked:
            b += 2 * _nbytes((bt, S_pad, 1), jnp.float32)
            b += 2 * _nbytes((1, H), jnp.float32)
        return b

    vmem_cap = _vmem_capacity_bytes()
    vmem_budget = vmem_cap - (8 << 20)

    if batch_tile is None:
        batch_tile = max(1, min(B, pl.cdiv(512, S_pad)))     # ~512 MXU rows per step
    batch_tile = max(1, min(batch_tile, B))
    while B % batch_tile:
        batch_tile -= 1
    while batch_tile > 1 and _block_bytes(batch_tile) > vmem_budget:
        batch_tile -= 1
        while B % batch_tile:
            batch_tile -= 1
    grid = (B // batch_tile,)

    vmem_limit = int(min(max(_block_bytes(batch_tile) + (2 << 20), 8 << 20),
                         vmem_cap - (2 << 20)))

    patches_spec = pl.BlockSpec((batch_tile, S_pad, P), lambda i: (i, 0, 0))
    wp_spec = pl.BlockSpec((P, H), lambda i: (0, 0))
    pos_spec = pl.BlockSpec((S_pad, H), lambda i: (0, 0))
    out_spec = pl.BlockSpec((batch_tile, S, H), lambda i: (i, 0, 0))
    # Note: constant-index operands (wp/pos/mask_tok) keep constant block indices,
    # so Pallas skips their re-DMA across steps.

    if masked:
        kernel = functools.partial(_embed_mask_kernel, seq_len=S)
        in_specs = [patches_spec,
                    pl.BlockSpec((batch_tile, S_pad, 1), lambda i: (i, 0, 0)),
                    wp_spec,
                    pl.BlockSpec((1, H), lambda i: (0, 0)),
                    pos_spec]
        operands = (x, w, wp, mask_tok, pos_tab)
    else:
        kernel = functools.partial(_embed_kernel, seq_len=S)
        in_specs = [patches_spec, wp_spec, pos_spec]
        operands = (x, wp, pos_tab)

    return pl.pallas_call(
        kernel,
        out_shape=jax.ShapeDtypeStruct((B, S, H), out_dtype),
        grid_spec=pltpu.PrefetchScalarGridSpec(
            num_scalar_prefetch=0,
            grid=grid,
            in_specs=in_specs,
            out_specs=out_spec),
        compiler_params=pltpu.CompilerParams(
            dimension_semantics=("parallel",),
            vmem_limit_bytes=vmem_limit),
    )(*operands)


# ----------------------------- reference ---------------------------------- #

def _reference(pixel_values, params, bool_masked_pos, patch_size):
    """Pure-JAX mirror of Data2VecVisionEmbeddings.forward (eval mode)."""
    ph = pw = patch_size
    emb = jax.lax.conv_general_dilated(
        pixel_values, params["proj_w"],
        window_strides=(ph, pw), padding="VALID",
        dimension_numbers=("NCHW", "OIHW", "NCHW"))
    emb = emb + params["proj_b"].reshape(1, -1, 1, 1)
    B, H, Hp, Wp = emb.shape
    emb = emb.reshape(B, H, Hp * Wp).transpose(0, 2, 1)      # (B, N, H)
    if bool_masked_pos is not None:
        w = bool_masked_pos.astype(jnp.float32)[..., None]
        mask_tokens = jnp.broadcast_to(params["mask_token"].reshape(1, 1, H),
                                       emb.shape)
        emb = emb * (1.0 - w) + mask_tokens * w
    cls = jnp.broadcast_to(params["cls_token"].reshape(1, 1, H), (B, 1, H))
    emb = jnp.concatenate([cls, emb], axis=1)
    emb = emb + params["position_embeddings"]
    return emb


if __name__ == "__main__":
    # small config: 16x16 image, patch 4 -> 16 patches (+1 CLS = 17), hidden=32, batch=2
    B, C, IMG, PATCH, H = 2, 3, 16, 4, 32
    N = (IMG // PATCH) ** 2
    S = N + 1

    key = jax.random.PRNGKey(0)
    ks = jax.random.split(key, 7)
    scale = 0.02
    params = {
        "proj_w": scale * jax.random.normal(ks[0], (H, C, PATCH, PATCH), jnp.float32),
        "proj_b": scale * jax.random.normal(ks[1], (H,), jnp.float32),
        "cls_token": scale * jax.random.normal(ks[2], (1, 1, H), jnp.float32),
        "mask_token": scale * jax.random.normal(ks[3], (1, 1, H), jnp.float32),
        "position_embeddings": scale * jax.random.normal(ks[4], (1, S, H), jnp.float32),
    }
    pixel_values = jax.random.normal(ks[5], (B, C, IMG, IMG), jnp.float32)
    bool_masked_pos = jax.random.bernoulli(ks[6], 0.4, (B, N))

    # masked path
    out_m = data2vec_vision_embeddings(pixel_values, params, bool_masked_pos,
                                       patch_size=PATCH)
    out_m = jax.block_until_ready(out_m)
    ref_m = _reference(pixel_values, params, bool_masked_pos, PATCH)
    np.testing.assert_allclose(np.asarray(out_m), np.asarray(ref_m),
                               rtol=2e-2, atol=2e-2)

    # no-mask (inference) path -> specialized kernel without mask DMA/math
    out_u = data2vec_vision_embeddings(pixel_values, params, None,
                                       patch_size=PATCH)
    out_u = jax.block_until_ready(out_u)
    ref_u = _reference(pixel_values, params, None, PATCH)
    np.testing.assert_allclose(np.asarray(out_u), np.asarray(ref_u),
                               rtol=2e-2, atol=2e-2)

    print("KERNEL_OK")
</pallas_src>

<mosaic_0001>
module attributes {stable_mosaic.version = 11 : i64} {
  func.func @_embed_mask_kernel(%arg0: i32, %arg1: memref<2x24x48xbf16, #tpu.memory_space<vmem>>, %arg2: memref<2x24x1xf32, #tpu.memory_space<vmem>>, %arg3: memref<48x32xbf16, #tpu.memory_space<vmem>>, %arg4: memref<1x32xf32, #tpu.memory_space<vmem>>, %arg5: memref<24x32xf32, #tpu.memory_space<vmem>>, %arg6: memref<2x17x32xf32, #tpu.memory_space<vmem>>) attributes {dimension_semantics = [#tpu.dimension_semantics<parallel>], iteration_bounds = array<i64: 1>, scalar_prefetch = 0 : i64, scratch_operands = 0 : i64, tpu.core_type = #tpu.core_type<tc>, window_params = [{transform_indices = @transform_0, window_bounds = array<i64: 2, 24, 48>}, {transform_indices = @transform_1, window_bounds = array<i64: 2, 24, 1>}, {pipeline_mode = #tpu.pipeline_mode<synchronous>, transform_indices = @transform_2, window_bounds = array<i64: 48, 32>}, {pipeline_mode = #tpu.pipeline_mode<synchronous>, transform_indices = @transform_3, window_bounds = array<i64: 1, 32>}, {pipeline_mode = #tpu.pipeline_mode<synchronous>, transform_indices = @transform_4, window_bounds = array<i64: 24, 32>}, {transform_indices = @transform_5, window_bounds = array<i64: 2, 17, 32>}]} {
    %c0 = arith.constant 0 : index
    %c0_0 = arith.constant 0 : index
    %c0_1 = arith.constant 0 : index
    %0 = vector.load %arg1[%c0, %c0_0, %c0_1] : memref<2x24x48xbf16, #tpu.memory_space<vmem>>, vector<2x24x48xbf16>
    %1 = vector.shape_cast %0 : vector<2x24x48xbf16> to vector<48x48xbf16>
    %c0_2 = arith.constant 0 : index
    %c0_3 = arith.constant 0 : index
    %2 = vector.load %arg3[%c0_2, %c0_3] : memref<48x32xbf16, #tpu.memory_space<vmem>>, vector<48x32xbf16>
    %cst = arith.constant dense<0.000000e+00> : vector<48x32xf32>
    %3 = tpu.matmul %1, %2, %cst {dimension_numbers = #tpu.dot_dimension_numbers<[1], [0], [0], [1], [0, 0, 1, 1], [], []>} : vector<48x48xbf16>, vector<48x32xbf16>, vector<48x32xf32> -> vector<48x32xf32>
    %4 = vector.shape_cast %3 : vector<48x32xf32> to vector<2x24x32xf32>
    %c0_4 = arith.constant 0 : index
    %c0_5 = arith.constant 0 : index
    %c0_6 = arith.constant 0 : index
    %5 = vector.load %arg2[%c0_4, %c0_5, %c0_6] : memref<2x24x1xf32, #tpu.memory_space<vmem>>, vector<2x24x1xf32>
    %cst_7 = arith.constant 1.000000e+00 : f32
    %6 = vector.broadcast %cst_7 : f32 to vector<2x24x1xf32>
    %7 = arith.subf %6, %5 : vector<2x24x1xf32>
    %8 = vector.broadcast %7 : vector<2x24x1xf32> to vector<2x24x32xf32>
    %9 = arith.mulf %4, %8 : vector<2x24x32xf32>
    %c0_8 = arith.constant 0 : index
    %c0_9 = arith.constant 0 : index
    %10 = vector.load %arg4[%c0_8, %c0_9] : memref<1x32xf32, #tpu.memory_space<vmem>>, vector<1x32xf32>
    %11 = vector.shape_cast %10 : vector<1x32xf32> to vector<1x1x32xf32>
    %12 = vector.broadcast %11 : vector<1x1x32xf32> to vector<2x24x32xf32>
    %13 = vector.broadcast %5 : vector<2x24x1xf32> to vector<2x24x32xf32>
    %14 = arith.mulf %12, %13 : vector<2x24x32xf32>
    %15 = arith.addf %9, %14 : vector<2x24x32xf32>
    %c0_10 = arith.constant 0 : index
    %c0_11 = arith.constant 0 : index
    %16 = vector.load %arg5[%c0_10, %c0_11] : memref<24x32xf32, #tpu.memory_space<vmem>>, vector<24x32xf32>
    %17 = vector.shape_cast %16 : vector<24x32xf32> to vector<1x24x32xf32>
    %18 = vector.broadcast %17 : vector<1x24x32xf32> to vector<2x24x32xf32>
    %19 = arith.addf %15, %18 : vector<2x24x32xf32>
    %20 = vector.extract_strided_slice %19 {offsets = [0, 0, 0], sizes = [2, 17, 32], strides = [1, 1, 1]} : vector<2x24x32xf32> to vector<2x17x32xf32>
    %c0_12 = arith.constant 0 : index
    %c0_13 = arith.constant 0 : index
    %c0_14 = arith.constant 0 : index
    %21 = vector.load %arg6[%c0_12, %c0_13, %c0_14] : memref<2x17x32xf32, #tpu.memory_space<vmem>>, vector<2x17x32xf32>
    tpu.vector_store %arg6[%c0_12, %c0_13, %c0_14], %20 {strides = array<i32>} : memref<2x17x32xf32, #tpu.memory_space<vmem>>, vector<2x17x32xf32>,
    return
  }
  func.func @transform_0(%arg0: i32) -> (i32, i32, i32) {
    %c0_i32 = arith.constant 0 : i32
    %c0_i32_0 = arith.constant 0 : i32
    %c0_i32_1 = arith.constant 0 : i32
    return %arg0, %c0_i32, %c0_i32_0 : i32, i32, i32
  }
  func.func @transform_1(%arg0: i32) -> (i32, i32, i32) {
    %c0_i32 = arith.constant 0 : i32
    %c0_i32_0 = arith.constant 0 : i32
    %c0_i32_1 = arith.constant 0 : i32
    return %arg0, %c0_i32, %c0_i32_0 : i32, i32, i32
  }
  func.func @transform_2(%arg0: i32) -> (i32, i32) {
    %c0_i32 = arith.constant 0 : i32
    %c0_i32_0 = arith.constant 0 : i32
    %c0_i32_1 = arith.constant 0 : i32
    return %c0_i32, %c0_i32_0 : i32, i32
  }
  func.func @transform_3(%arg0: i32) -> (i32, i32) {
    %c0_i32 = arith.constant 0 : i32
    %c0_i32_0 = arith.constant 0 : i32
    %c0_i32_1 = arith.constant 0 : i32
    return %c0_i32, %c0_i32_0 : i32, i32
  }
  func.func @transform_4(%arg0: i32) -> (i32, i32) {
    %c0_i32 = arith.constant 0 : i32
    %c0_i32_0 = arith.constant 0 : i32
    %c0_i32_1 = arith.constant 0 : i32
    return %c0_i32, %c0_i32_0 : i32, i32
  }
  func.func @transform_5(%arg0: i32) -> (i32, i32, i32) {
    %c0_i32 = arith.constant 0 : i32
    %c0_i32_0 = arith.constant 0 : i32
    %c0_i32_1 = arith.constant 0 : i32
    return %arg0, %c0_i32, %c0_i32_0 : i32, i32, i32
  }
}

</mosaic_0001>

<bundles_post_ra>
// kernel: tpu_custom_call.1
= control target key start
LH: loop header
LB: loop body
LE: loop exit
PB: predicated region body
PF: predicated region fallthrough
CT: control target
= control target key end

     0   :  { %v302_v0 = vmov 0.0   ;;  %vm303_vm0 = vmmov 0   ;;  %v304_v3 = vmov 0   ;;  %vm66_vm1 = vcmask 392192   ;;  %s410_s2 = inlined_call_operand.vmem [shape: bf16[48,32], index: 2, kind: input, shape index: {}]   ;;  %s411_s0 = inlined_call_operand.vmem [shape: bf16[2,24,48], index: 0, kind: input, shape index: {}]   ;;  %s412_s1 = inlined_call_operand.vmem [shape: f32[2,24,1], index: 1, kind: input, shape index: {}]   ;;  %s413_s3 = inlined_call_operand.vmem [shape: f32[1,32], index: 3, kind: input, shape index: {}]   ;;  %s414_s4 = inlined_call_operand.vmem [shape: f32[24,32], index: 4, kind: input, shape index: {}]   ;;  %s415_s5 = inlined_call_operand.vmem [shape: f32[2,17,32], index: 5, kind: output, shape index: {}]  }
   0x1   :  { %267 = vmatprep.subr.bf16.mxu0 %v302_v0  ;;  %285 = vmatprep.subr.bf16.mxu1 %v302_v0  ;;  %v296_v1 = vld [vmem:[%s410_s2] sm:$0xff]   ;;  %v297_v2 = vld [vmem:[%s410_s2 + $0x8] sm:$0xff]   ;;  %v298_v4 = vld [vmem:[%s410_s2 + $0x10] sm:$0xff]   ;;  %vm239_vm2 = vcmask 261120   ;;  %vm242_vm3 = vcmask 253952  }
   0x2   :  { %273 = vmatprep.mubr.msk.bf16.mxu0 %vm303_vm0, %v302_v0  ;;  %277 = vmatprep.mubr.msk.bf16.mxu1 %vm303_vm0, %v302_v0  ;;  %v135_v5 = vld [vmem:[%s412_s1 + $0x10] sm:$0xff]  ;;  %v133_v6 = vld [vmem:[%s412_s1] sm:$0xff]  ;;  %v136_v9 = vld [vmem:[%s412_s1 + $0x18] sm:$0xff] }
   0x3   :  { %268 = vmatpush3.bf16.msra.mxu0 %v296_v1  ;;  %288 = vmatpush3.bf16.msra.mxu1 %v296_v1  ;;  %v141_v7 = vsub.f32 1.0, %v135_v5  ;;  %v139_v8 = vsub.f32 1.0, %v133_v6  ;;  %v134_v10 = vld [vmem:[%s412_s1 + $0x8] sm:$0xff]  ;;  %v299_v11 = vld [vmem:[%s411_s0] sm:$0xff]   ;;  %v142_v13 = vsub.f32 1.0, %v136_v9  ;;  %v301_v19 = vld [vmem:[%s411_s0 + $0x10] sm:$0xff]  }
   0x4   :  { %269 = vmatprep.subr.bf16.mxu0 %v302_v0  ;;  %286 = vmatprep.subr.bf16.mxu1 %v302_v0  ;;  %v300_v12 = vld [vmem:[%s411_s0 + $0x8] sm:$0xff]   ;;  %v140_v14 = vsub.f32 1.0, %v134_v10  ;;  %v137_v16 = vld [vmem:[%s412_s1 + $0x20] sm:$0xff]  ;;  %v232_v42 = vld [vmem:[%s414_s4 + $0x10] sm:$0xff] }
   0x5   :  { %295 = vset.pattern.permute.xlu1 %v304_v3  ;;  %294 = vset.pattern.permute.xlu0 %v304_v3  ;;  %v138_v15 = vld [vmem:[%s412_s1 + $0x28] sm:$0xff]  ;;  %v143_v18 = vsub.f32 1.0, %v137_v16  ;;  %v260_v28 = vld [vmem:[%s413_s3] ss:$0 sm:$0xff] }
   0x6   :  { %157 = vperm.xlu1 %295, %v141_v7   ;;  %147 = vperm.xlu0 %294, %v139_v8   ;;  %v144_v17 = vsub.f32 1.0, %v138_v15  ;;  %v230_v41 = vld [vmem:[%s414_s4] sm:$0xff]  ;;  %v231_v51 = vld [vmem:[%s414_s4 + $0x8] sm:$0xff] }
   0x7   :  { %270 = vmatpush3.bf16.msra.mxu0 %v297_v2  ;;  %289 = vmatpush3.bf16.msra.mxu1 %v297_v2 }
   0x8   :  { %271 = vmatprep.subr.bf16.mxu0 %v302_v0  ;;  %287 = vmatprep.subr.bf16.mxu1 %v302_v0 }
   0xa   :  { %162 = vperm.xlu1 %295, %v142_v13   ;;  %152 = vperm.xlu0 %294, %v140_v14  }
   0xb   :  { %272 = vmatpush3.bf16.msra.mxu0 %v298_v4  ;;  %290 = vmatpush3.bf16.msra.mxu1 %v298_v4 }
   0xe   :  { %274 = vmatmul.mubr.msk.bf16.vlgmr.msra.gmra.mrb[0].mxu0 %vm66_vm1, %v299_v11  ;;  %278 = vmatmul.mubr.msk.bf16.vlgmr.msra.gmra.mrb[0].mxu1 %vm66_vm1, %v300_v12 }
   0xf   :  { %281 = vmatprep.mubr.msk.bf16.mxu1 %vm303_vm0, %v302_v0  ;;  %172 = vperm.xlu1 %295, %v144_v17  }
  0x10   :  { %167 = vperm.xlu0 %294, %v143_v18  }
  0x13   :  { %195 = vperm.xlu1 %295, %v134_v10  }
  0x14   :  { %190 = vperm.xlu0 %294, %v133_v6  }
  0x16   :  { %282 = vmatmul.mubr.msk.bf16.gmra.mrb[4].mxu1 %vm66_vm1, %v301_v19 }
  0x17   :  { %205 = vperm.xlu1 %295, %v136_v9  }
  0x18   :  { %200 = vperm.xlu0 %294, %v135_v5  }
  0x1b   :  { %215 = vperm.xlu1 %295, %v138_v15  }
  0x1c   :  { %210 = vperm.xlu0 %294, %v137_v16  }
  0x85   :  { %v158_v20 = vpop.permute.xlu1 %157  ;;  %v148_v21 = vpop.permute.xlu0 %147 }
  0x89   :  { %v163_v22 = vpop.permute.xlu1 %162  ;;  %v153_v23 = vpop.permute.xlu0 %152 }
  0x8e   :  { %v173_v24 = vpop.permute.xlu1 %172 }
  0x8f   :  { %v168_v25 = vpop.permute.xlu0 %167 }
  0x92   :  { %v196_v26 = vpop.permute.xlu1 %195 }
  0x93   :  { %v191_v27 = vpop.permute.xlu0 %190  ;;  %v219_v39 = vmul.f32 %v260_v28, %v196_v26 }
  0x94   :  { %v218_v33 = vmul.f32 %v260_v28, %v191_v27 }
  0x96   :  { %v206_v29 = vpop.permute.xlu1 %205 }
  0x97   :  { %v201_v30 = vpop.permute.xlu0 %200  ;;  %v221_v40 = vmul.f32 %v260_v28, %v206_v29 }
  0x98   :  { %v220_v34 = vmul.f32 %v260_v28, %v201_v30 }
  0x9a   :  { %v216_v59 = vpop.permute.xlu1 %215 }
  0x9b   :  { %v211_v56 = vpop.permute.xlu0 %210  ;;  %v223_v1 = vmul.f32 %v260_v28, %v216_v59 }
  0x9c   :  { %v222_v61 = vmul.f32 %v260_v28, %v211_v56 }
  0xe1   :  { %v110_v31 = vpop.f32.mrb[0].mxu0  ;;  %v118_v32 = vpop.f32.mrb[0].mxu1 }
  0xe2   :  { %v175_v35 = vmul.f32 %v148_v21, %v110_v31  ;;  %v177_v36 = vmul.f32 %v158_v20, %v118_v32  ;;  %v275_v37 = vpop.f32.mrb[1].mxu0  ;;  %v279_v38 = vpop.f32.mrb[1].mxu1 }
  0xe3   :  { %v113_v43 = vpop.f32.mrb[2].mxu0  ;;  %v121_v44 = vpop.f32.mrb[2].mxu1 }
  0xe4   :  { %v224_v45 = vadd.f32 %v218_v33, %v175_v35  ;;  %v226_v46 = vadd.f32 %v220_v34, %v177_v36  ;;  %v176_v47 = vmul.f32 %v153_v23, %v113_v43  ;;  %v178_v48 = vmul.f32 %v163_v22, %v121_v44  ;;  %v280_v49 = vpop.f32.mrb[3].mxu1  ;;  %v276_v50 = vpop.f32.mrb[3].mxu0 }
  0xe6   :  { %v233_v52 = vadd.f32 %v230_v41, %v224_v45  ;;  %v235_v53 = vadd.f32 %v232_v42, %v226_v46  ;;  %v225_v54 = vadd.f32 %v219_v39, %v176_v47  ;;  %v227_v55 = vadd.f32 %v221_v40, %v178_v48 }
  0xe8   :  { %240 = vst.msk [vmem:[%s415_s5] sm:$0xff] %vm239_vm2, %v233_v52  ;;  %v234_v57 = vadd.f32 %v231_v51, %v225_v54  ;;  %v236_v58 = vadd.f32 %v230_v41, %v227_v55 }
  0xe9   :  { %243 = vst.msk [vmem:[%s415_s5 + $0x10] sm:$0x1] %vm242_vm3, %v235_v53  ;;  %v126_v60 = vpop.f32.mrb[4].mxu1 }
  0xea   :  { %241 = vst.msk [vmem:[%s415_s5 + $0x8] sm:$0xff] %vm239_vm2, %v234_v57  ;;  %244 = vst.msk [vmem:[%s415_s5 + $0x18] sm:$0xff] %vm239_vm2, %v236_v58  ;;  %v179_v62 = vmul.f32 %v168_v25, %v126_v60  ;;  %v283_v63 = vpop.f32.mrb[5].mxu1 }
  0xeb   :  { %v129_v0 = vpop.f32.mrb[6].mxu1 }
  0xec   :  { %v228_v2 = vadd.f32 %v222_v61, %v179_v62  ;;  %v180_v3 = vmul.f32 %v173_v24, %v129_v0  ;;  %v284_v4 = vpop.f32.mrb[7].mxu1 }
  0xee   :  { %v237_v5 = vadd.f32 %v231_v51, %v228_v2  ;;  %v229_v6 = vadd.f32 %v223_v1, %v180_v3 }
  0xf0   :  { %245 = vst.msk [vmem:[%s415_s5 + $0x20] sm:$0xff] %vm239_vm2, %v237_v5  ;;  %v238_v7 = vadd.f32 %v232_v42, %v229_v6 }
  0xf2   :  { %246 = vst.msk [vmem:[%s415_s5 + $0x28] sm:$0x1] %vm242_vm3, %v238_v7 }

</bundles_post_ra>
